<compile_context>
chip_gen: v7x
topology: tpu7x:2x2x1
jax: 0.10.0
libtpu: 0.0.40
codegen_flags: <defaults>
</compile_context>

<pallas_src>
import functools

import jax
import jax.numpy as jnp
from jax.experimental import pallas as pl
from jax.experimental.pallas import tpu as pltpu

_EPS = 1e-8                      # torch F.cosine_similarity default eps
_LANES = 128
_SUBLANES = 8
# ~4 MiB per input block -> ~16-18 MiB double-buffered working set: fits the
# scoped-VMEM budget on v5e/v6e and leaves headroom on v7x's 64 MiB VMEM.
_TARGET_BLOCK_BYTES = 4 * 1024 * 1024


def _cos_loss_kernel(x_ref, y_ref, o_ref, *, s_total, tile_sub, ragged):
    """One block: (C, tile_sub, 128) of each input -> (1, 128) partial sums."""
    x = x_ref[...].astype(jnp.float32)          # (C, tile_sub, 128)
    y = y_ref[...].astype(jnp.float32)

    # Reductions over C = dense VPU adds over (tile_sub, 128) slabs.
    dot = jnp.sum(x * y, axis=0)                # (tile_sub, 128)
    xx = jnp.sum(x * x, axis=0)
    yy = jnp.sum(y * y, axis=0)

    # torch: dot / max(||x||*||y||, eps)  ==  dot * rsqrt(max(xx*yy, eps^2))
    # (single EUP rsqrt instead of 2 sqrt + 1 divide).
    cos = dot * jax.lax.rsqrt(jnp.maximum(xx * yy, jnp.float32(_EPS * _EPS)))

    if ragged:
        # Last spatial tile over-reads past S: mask those sub-rows to zero.
        t = pl.program_id(1)
        row = jax.lax.broadcasted_iota(jnp.int32, cos.shape, 0)
        cos = jnp.where(t * tile_sub + row < s_total, cos, 0.0)

    # Per-lane partial sums only; the single cross-lane reduce happens in JAX.
    o_ref[...] = jnp.sum(cos, axis=0, keepdims=True)   # (1, 128)


def cosine_similarity_loss(inputs, targets):
    """Pallas implementation of CosineSimilarityLoss.forward (NCHW, dim=1)."""
    assert inputs.shape == targets.shape
    assert inputs.ndim >= 2
    shape = inputs.shape
    n, c = shape[0], shape[1]
    hw = 1
    for d in shape[2:]:
        hw *= d

    n_rows = n * hw                           # number of cosine values
    s = (hw + _LANES - 1) // _LANES           # spatial sub-rows of 128 lanes
    hw_pad = s * _LANES

    # Free reshapes (trailing contiguous dims); no transpose of C.
    x = inputs.reshape(n, c, hw)
    y = targets.reshape(n, c, hw)
    if hw_pad != hw:
        # Zero rows give cos == 0 so they don't perturb the sum.
        # TODO(synk): avoid this copy (only the ragged 128-lane tail needs it).
        x = jnp.pad(x, ((0, 0), (0, 0), (0, hw_pad - hw)))
        y = jnp.pad(y, ((0, 0), (0, 0), (0, hw_pad - hw)))
    x = x.reshape(n, c, s, _LANES)
    y = y.reshape(n, c, s, _LANES)

    # Biggest block that keeps 2 inputs x 2 buffers well inside VMEM.
    itemsize = inputs.dtype.itemsize
    row_bytes = c * _LANES * itemsize
    tile_sub = max(_SUBLANES,
                   (_TARGET_BLOCK_BYTES // row_bytes) // _SUBLANES * _SUBLANES)
    if tile_sub >= s:
        tile_sub = s                          # full-extent block (always legal)
    grid_t = (s + tile_sub - 1) // tile_sub
    ragged = grid_t * tile_sub != s

    block_bytes = c * tile_sub * _LANES * itemsize
    vmem_limit = int(min(48 * 1024 * 1024,
                         max(32 * 1024 * 1024, 4 * block_bytes + (2 << 20))))

    kernel = functools.partial(
        _cos_loss_kernel, s_total=s, tile_sub=tile_sub, ragged=ragged)

    partials = pl.pallas_call(
        kernel,
        out_shape=jax.ShapeDtypeStruct((n, grid_t, 1, _LANES), jnp.float32),
        grid_spec=pltpu.PrefetchScalarGridSpec(
            num_scalar_prefetch=0,
            grid=(n, grid_t),
            in_specs=[
                pl.BlockSpec((None, c, tile_sub, _LANES),
                             lambda i, t: (i, 0, t, 0)),
                pl.BlockSpec((None, c, tile_sub, _LANES),
                             lambda i, t: (i, 0, t, 0)),
            ],
            out_specs=pl.BlockSpec((None, None, 1, _LANES),
                                   lambda i, t: (i, t, 0, 0)),
        ),
        compiler_params=pltpu.CompilerParams(
            # No carried accumulator -> every grid step is independent; lets
            # the v7x megacore split the grid across TensorCores.
            dimension_semantics=("parallel", "parallel"),
            vmem_limit_bytes=vmem_limit,
        ),
    )(x, y)

    return 1.0 - jnp.sum(partials) / jnp.float32(n_rows)


def _reference_loss(inputs, targets):
    """Pure-JAX reference mirroring torch F.cosine_similarity + mean."""
    x = inputs.astype(jnp.float32)
    y = targets.astype(jnp.float32)
    dot = jnp.sum(x * y, axis=1)
    nx = jnp.sqrt(jnp.sum(x * x, axis=1))
    ny = jnp.sqrt(jnp.sum(y * y, axis=1))
    cos = dot / jnp.maximum(nx * ny, _EPS)
    return 1.0 - jnp.mean(cos)


if __name__ == "__main__":
    key = jax.random.PRNGKey(0)
    k1, k2 = jax.random.split(key)
    # Small NCHW shapes consistent with the module's forward (dim=1 reduction).
    inputs = jax.random.normal(k1, (2, 4, 16, 16), dtype=jnp.float32)
    targets = jax.random.normal(k2, (2, 4, 16, 16), dtype=jnp.float32)

    loss = jax.jit(cosine_similarity_loss)(inputs, targets)
    loss = jax.block_until_ready(loss)

    ref = _reference_loss(inputs, targets)
    assert jnp.allclose(loss, ref, atol=2e-5, rtol=2e-5), (loss, ref)

    print("KERNEL_OK")
</pallas_src>

<mosaic_0001>
module attributes {stable_mosaic.version = 11 : i64} {
  func.func @_cos_loss_kernel(%arg0: i32, %arg1: i32, %arg2: memref<1x4x2x128xf32, #tpu.memory_space<vmem>>, %arg3: memref<1x4x2x128xf32, #tpu.memory_space<vmem>>, %arg4: memref<1x1x1x128xf32, #tpu.memory_space<vmem>>) attributes {dimension_semantics = [#tpu.dimension_semantics<parallel>, #tpu.dimension_semantics<parallel>], iteration_bounds = array<i64: 2, 1>, scalar_prefetch = 0 : i64, scratch_operands = 0 : i64, tpu.core_type = #tpu.core_type<tc>, window_params = [{transform_indices = @transform_0, window_bounds = array<i64: 1, 4, 2, 128>}, {transform_indices = @transform_1, window_bounds = array<i64: 1, 4, 2, 128>}, {transform_indices = @transform_2, window_bounds = array<i64: 1, 1, 1, 128>}]} {
    %c0 = arith.constant 0 : index
    %c0_0 = arith.constant 0 : index
    %c0_1 = arith.constant 0 : index
    %c0_2 = arith.constant 0 : index
    %0 = vector.load %arg2[%c0, %c0_0, %c0_1, %c0_2] : memref<1x4x2x128xf32, #tpu.memory_space<vmem>>, vector<1x4x2x128xf32>
    %1 = vector.shape_cast %0 : vector<1x4x2x128xf32> to vector<4x2x128xf32>
    %c0_3 = arith.constant 0 : index
    %c0_4 = arith.constant 0 : index
    %c0_5 = arith.constant 0 : index
    %c0_6 = arith.constant 0 : index
    %2 = vector.load %arg3[%c0_3, %c0_4, %c0_5, %c0_6] : memref<1x4x2x128xf32, #tpu.memory_space<vmem>>, vector<1x4x2x128xf32>
    %3 = vector.shape_cast %2 : vector<1x4x2x128xf32> to vector<4x2x128xf32>
    %4 = arith.mulf %1, %3 : vector<4x2x128xf32>
    %cst = arith.constant dense<0.000000e+00> : vector<2x128xf32>
    %5 = vector.multi_reduction <add>, %4, %cst [0] : vector<4x2x128xf32> to vector<2x128xf32>
    %6 = arith.mulf %1, %1 : vector<4x2x128xf32>
    %cst_7 = arith.constant dense<0.000000e+00> : vector<2x128xf32>
    %7 = vector.multi_reduction <add>, %6, %cst_7 [0] : vector<4x2x128xf32> to vector<2x128xf32>
    %8 = arith.mulf %3, %3 : vector<4x2x128xf32>
    %cst_8 = arith.constant dense<0.000000e+00> : vector<2x128xf32>
    %9 = vector.multi_reduction <add>, %8, %cst_8 [0] : vector<4x2x128xf32> to vector<2x128xf32>
    %10 = arith.mulf %7, %9 : vector<2x128xf32>
    %cst_9 = arith.constant 1.000000e-16 : f32
    %11 = vector.broadcast %cst_9 : f32 to vector<2x128xf32>
    %12 = arith.maximumf %10, %11 : vector<2x128xf32>
    %13 = math.rsqrt %12 : vector<2x128xf32>
    %14 = arith.mulf %5, %13 : vector<2x128xf32>
    %cst_10 = arith.constant dense<0.000000e+00> : vector<128xf32>
    %15 = vector.multi_reduction <add>, %14, %cst_10 [0] : vector<2x128xf32> to vector<128xf32>
    %16 = vector.shape_cast %15 : vector<128xf32> to vector<1x128xf32>
    %c0_11 = arith.constant 0 : index
    %c0_12 = arith.constant 0 : index
    %c0_13 = arith.constant 0 : index
    %c0_14 = arith.constant 0 : index
    %17 = vector.load %arg4[%c0_11, %c0_12, %c0_13, %c0_14] : memref<1x1x1x128xf32, #tpu.memory_space<vmem>>, vector<1x1x1x128xf32>
    %18 = vector.shape_cast %17 : vector<1x1x1x128xf32> to vector<1x128xf32>
    %19 = vector.shape_cast %16 : vector<1x128xf32> to vector<1x1x1x128xf32>
    tpu.vector_store %arg4[%c0_11, %c0_12, %c0_13, %c0_14], %19 {strides = array<i32>} : memref<1x1x1x128xf32, #tpu.memory_space<vmem>>, vector<1x1x1x128xf32>,
    return
  }
  func.func @transform_0(%arg0: i32, %arg1: i32) -> (i32, i32, i32, i32) {
    %c0_i32 = arith.constant 0 : i32
    %c0_i32_0 = arith.constant 0 : i32
    %c0_i32_1 = arith.constant 0 : i32
    return %arg0, %c0_i32, %arg1, %c0_i32_0 : i32, i32, i32, i32
  }
  func.func @transform_1(%arg0: i32, %arg1: i32) -> (i32, i32, i32, i32) {
    %c0_i32 = arith.constant 0 : i32
    %c0_i32_0 = arith.constant 0 : i32
    %c0_i32_1 = arith.constant 0 : i32
    return %arg0, %c0_i32, %arg1, %c0_i32_0 : i32, i32, i32, i32
  }
  func.func @transform_2(%arg0: i32, %arg1: i32) -> (i32, i32, i32, i32) {
    %c0_i32 = arith.constant 0 : i32
    %c0_i32_0 = arith.constant 0 : i32
    %c0_i32_1 = arith.constant 0 : i32
    return %arg0, %arg1, %c0_i32, %c0_i32_0 : i32, i32, i32, i32
  }
}

</mosaic_0001>

<bundles_post_ra>
// kernel: cosine_similarity_loss.1
= control target key start
LH: loop header
LB: loop body
LE: loop exit
PB: predicated region body
PF: predicated region fallthrough
CT: control target
= control target key end

     0   :  { %s423_s9 = smov 0   ;;  %s425_s10 = smov 0   ;;  %s476_s0 = inlined_call_operand.vmem [shape: f32[2,4,2,128], index: 0, kind: input, shape index: {}]   ;;  %s477_s1 = inlined_call_operand.vmem [shape: f32[2,4,2,128], index: 1, kind: input, shape index: {}]   ;;  %s478_s2 = inlined_call_operand.vmem [shape: f32[2,1,1,128], index: 2, kind: output, shape index: {}]  }
   0x1   :  { %s427_s11 = smov 0  }
   0x2 LB: > { %s24_s12 = sadd.s32 1, %s402_s10  ;;  %p349_p0 = scmp.ge.s32.totalorder %s406_s11, 1  ;;  %s406_s11 = sphi %s427_s11, %s12_s11   ;;  %s402_s10 = sphi %s425_s10, %s480_s10   ;;  %s398_s9 = sphi %s423_s9, %s479_s9  }
   0x3   : > { %p26_p1 = scmp.ge.s32.totalorder %s24_s12, 2  ;;  %p146_p2 = scmp.lt.s32.totalorder %s406_s11, 3 }
   0x5   : > { %s482_s12 = smov (%p26_p1, %s24_s12), 0  ;;  %p147_p3 = pnand %p349_p0, %p146_p2 }
   0x6   : > { %p180_p4 = scmp.lt.s32.totalorder (!%p147_p3), %s398_s9, 1  ;;  %vm214_vm0 = vcmask (!%p147_p3), 1041408  }
   0x7   : > { %150 = sbr.rel (%p147_p3) target bundleno = 60 (0x3c), region = 28 }
   0xe   : > { %s484_s9 = smov (!%p180_p4, %s398_s9), 1 }
   0xf   : > { %s356_s13 = sshll.u32 %s484_s9, 3  ;;  %s201_s22 = scalar_lea.vmem %s478_s2, %s484_s9 }
  0x10   : > { %s187_s16 = scalar_lea.vmem %s476_s0, %s356_s13  ;;  %s195_s19 = scalar_lea.vmem %s477_s1, %s356_s13 }
  0x11   : > { %v202_v0 = vld [vmem:[%s187_s16] sm:$0x3]  ;;  %v203_v1 = vld [vmem:[%s187_s16 + $0x2] sm:$0x3]  ;;  %v204_v2 = vld [vmem:[%s187_s16 + $0x4] sm:$0x3] }
  0x12   : > { %v205_v3 = vld [vmem:[%s187_s16 + $0x6] sm:$0x3]  ;;  %v206_v4 = vld [vmem:[%s195_s19] sm:$0x3]  ;;  %v222_v5 = vmul.f32 %v202_v0, %v202_v0  ;;  %v223_v6 = vmul.f32 %v203_v1, %v203_v1  ;;  %v224_v7 = vmul.f32 %v204_v2, %v204_v2  ;;  %v207_v8 = vld [vmem:[%s195_s19 + $0x2] sm:$0x3] }
  0x13   : > { %v208_v9 = vld [vmem:[%s195_s19 + $0x4] sm:$0x3]  ;;  %v209_v10 = vld [vmem:[%s195_s19 + $0x6] sm:$0x3]  ;;  %v233_v13 = vmul.f32 %v206_v4, %v206_v4  ;;  %v225_v14 = vmul.f32 %v205_v3, %v205_v3  ;;  %v234_v17 = vmul.f32 %v207_v8, %v207_v8  ;;  %v210_v27 = vmul.f32 %v206_v4, %v202_v0 }
  0x14   : > { %v226_v11 = vsel %vm214_vm0, %v222_v5, 0.0  ;;  %v227_v12 = vsel %vm214_vm0, %v223_v6, 0.0  ;;  %v229_v16 = vsel %vm214_vm0, %v224_v7, 0.0  ;;  %v235_v18 = vmul.f32 %v208_v9, %v208_v9 }
  0x15   : > { %v228_v15 = vadd.f32 %v227_v12, %v226_v11  ;;  %v236_v19 = vmul.f32 %v209_v10, %v209_v10  ;;  %v237_v21 = vsel %vm214_vm0, %v233_v13, 0.0  ;;  %v231_v22 = vsel %vm214_vm0, %v225_v14, 0.0 }
  0x16   : > { %v238_v23 = vsel %vm214_vm0, %v234_v17, 0.0  ;;  %v240_v24 = vsel %vm214_vm0, %v235_v18, 0.0  ;;  %v211_v28 = vmul.f32 %v207_v8, %v203_v1  ;;  %v212_v32 = vmul.f32 %v208_v9, %v204_v2 }
  0x17   : > { %v230_v20 = vadd.f32 %v229_v16, %v228_v15  ;;  %v239_v25 = vadd.f32 %v238_v23, %v237_v21  ;;  %v242_v26 = vsel %vm214_vm0, %v236_v19, 0.0  ;;  %v215_v33 = vsel %vm214_vm0, %v210_v27, 0.0 }
  0x18   : > { %v216_v34 = vsel %vm214_vm0, %v211_v28, 0.0  ;;  %v213_v38 = vmul.f32 %v209_v10, %v205_v3  ;;  %v218_v39 = vsel %vm214_vm0, %v212_v32, 0.0 }
  0x19   : > { %v232_v29 = vadd.f32 %v231_v22, %v230_v20  ;;  %v241_v30 = vadd.f32 %v240_v24, %v239_v25  ;;  %v217_v37 = vadd.f32 %v216_v34, %v215_v33 }
  0x1a   : > { %v220_v41 = vsel %vm214_vm0, %v213_v38, 0.0 }
  0x1b   : > { %v243_v31 = vadd.f32 %v242_v26, %v241_v30  ;;  %v219_v40 = vadd.f32 %v218_v39, %v217_v37 }
  0x1d   : > { %v244_v35 = vmul.f32 %v243_v31, %v232_v29  ;;  %v221_v42 = vadd.f32 %v220_v41, %v219_v40 }
  0x1f   : > { %v245_v36 = vmax.f32 %v244_v35, 1e-16 }
  0x21   : > { %382 = vrsqrt.f32 %v245_v36 }
  0x2b   : > { %v383_v43 = vpop.eup %382 }
  0x2c   : > { %v247_v44 = vmul.f32 %v383_v43, %v221_v42 }
  0x2e   : > { %v248_v45 = vsel %vm214_vm0, %v247_v44, 0.0 }
  0x2f   : > { %v249_v46 = vrot.slane %v248_v45, 4 }
  0x31   : > { %v250_v47 = vadd.f32 %v249_v46, %v248_v45 }
  0x33   : > { %v251_v48 = vrot.slane %v250_v47, 2 }
  0x35   : > { %v252_v49 = vadd.f32 %v251_v48, %v250_v47 }
  0x37   : > { %v253_v50 = vrot.slane %v252_v49, 1 }
  0x39   : > { %v254_v51 = vadd.f32 %v253_v50, %v252_v49 }
  0x3b   : > { %255 = vst [vmem:[%s201_s22] sm:$0x1] %v254_v51 }
  0x3c PF: > { %s12_s11 = sadd.s32 1, %s406_s11   ;;  %s479_s9 = smov %s402_s10 }
  0x3d   : > { %p9_p5 = scmp.ge.s32.totalorder %s12_s11, 4   ;;  %s480_s10 = smov %s482_s12 }
  0x3f   :  { %11 = sbr.rel (!%p9_p5) target bundleno = 2 (0x2), region = 61 }

</bundles_post_ra>
